<compile_context>
chip_gen: v7x
topology: tpu7x:2x2x1
jax: 0.10.0
libtpu: 0.0.40
codegen_flags: <defaults>
</compile_context>

<pallas_src>
import functools

import jax
import jax.numpy as jnp
from jax.experimental import pallas as pl
from jax.experimental.pallas import tpu as pltpu


# ----------------------------------------------------------------------------
# Fused kernel: pre conv -> post conv -> down conv, one (batch, time-tile) step
# ----------------------------------------------------------------------------
def _down_block_kernel(xp_ref, xc_ref, xn_ref,
                       w1_ref, b1_ref, w2_ref, b2_ref, w3_ref, b3_ref,
                       out_ref, short_ref,
                       *, k, dil, stride, TT, TO, HX, HS, P3):
    # xp/xc/xn : (1, Cin, TT)  previous / current / next time tile of x
    # w*_ref   : (k, Cout, Cin) per-tap weights;  b*_ref : (Cout, 1)
    # out_ref  : (1, out_chs, TO)  down-conv output tile
    # short_ref: (1, short_chs, TT) shortcut (pre-conv output) tile
    i = pl.program_id(1)
    nt = pl.num_programs(1)
    f32 = jnp.float32

    # ---- assemble the x window with halo (time on lanes) -------------------
    xc = xc_ref[0].astype(f32)                                  # (Cin, TT)
    if HX > 0:
        xp = xp_ref[0].astype(f32)
        xn = xn_ref[0].astype(f32)
        xw = jnp.concatenate([xp[:, TT - HX:], xc, xn[:, :HX]], axis=-1)
        # zero the halo columns that fall outside the sequence (PyTorch zero pad)
        col = jax.lax.broadcasted_iota(jnp.int32, xw.shape, 1)
        valid = jnp.logical_and(
            jnp.logical_or(i > 0, col >= HX),
            jnp.logical_or(i < nt - 1, col < HX + TT))
        xw = jnp.where(valid, xw, 0.0)                          # (Cin, TT+2*HX)
    else:
        xw = xc

    # ---- pre conv (stride 1, dilation dil) + bias + ReLU --------------------
    WS = TT + 2 * HS
    acc = jnp.zeros((w1_ref.shape[1], WS), f32)
    for j in range(k):
        acc = acc + jnp.dot(w1_ref[j], xw[:, j * dil:j * dil + WS],
                            preferred_element_type=f32)
    sw = jnp.maximum(acc + b1_ref[...], 0.0)                    # (short_chs, WS)
    if HS > 0:
        # columns outside [0, T) must be exactly 0 (they are the post conv's
        # zero padding in the reference), not relu(bias).
        col = jax.lax.broadcasted_iota(jnp.int32, sw.shape, 1)
        valid = jnp.logical_and(
            jnp.logical_or(i > 0, col >= HS),
            jnp.logical_or(i < nt - 1, col < HS + TT))
        sw = jnp.where(valid, sw, 0.0)
    short_ref[0] = sw[:, HS:HS + TT].astype(short_ref.dtype)

    # ---- post conv (stride 1, dilation dil) + bias + ReLU -------------------
    WP = TT + 2 * P3
    acc = jnp.zeros((w2_ref.shape[1], WP), f32)
    for j in range(k):
        acc = acc + jnp.dot(w2_ref[j], sw[:, j * dil:j * dil + WP],
                            preferred_element_type=f32)
    pw = jnp.maximum(acc + b2_ref[...], 0.0)                    # (out_chs, WP)
    if P3 > 0:
        col = jax.lax.broadcasted_iota(jnp.int32, pw.shape, 1)
        valid = jnp.logical_and(
            jnp.logical_or(i > 0, col >= P3),
            jnp.logical_or(i < nt - 1, col < P3 + TT))
        pw = jnp.where(valid, pw, 0.0)

    # ---- down conv (stride `stride`, dilation 1) + bias + ReLU --------------
    acc = jnp.zeros((w3_ref.shape[1], TT), f32)                 # full-rate
    for j in range(k):
        acc = acc + jnp.dot(w3_ref[j], pw[:, j:j + TT],
                            preferred_element_type=f32)
    # stride-s down-sample via a 0/1 selection matmul: keeps the store
    # lane-dense and avoids lane-strided slices / gathers.
    rows = jax.lax.broadcasted_iota(jnp.int32, (TT, TO), 0)
    cols = jax.lax.broadcasted_iota(jnp.int32, (TT, TO), 1)
    sel = (rows == cols * stride).astype(f32)
    down = jnp.dot(acc, sel, preferred_element_type=f32)        # (out_chs, TO)
    out_ref[0] = jnp.maximum(down + b3_ref[...], 0.0).astype(out_ref.dtype)


def _pick_time_tile(T, stride, halo, max_tile):
    """Largest TT <= max_tile with TT | T and TT % (128*stride) == 0 (so both
    the full-rate and the down-sampled output blocks are lane aligned).
    Falls back to a single whole-axis tile (blocks == full dims)."""
    if T % stride != 0:
        return T
    quantum = 128 * stride
    best = None
    tt = quantum
    while tt <= min(T, max_tile):
        if T % tt == 0 and tt >= halo:
            best = tt
        tt += quantum
    return best if best is not None else T


# ----------------------------------------------------------------------------
# Wrapper: DownBlock forward, (out, shortcut) in PyTorch NCW layout
# ----------------------------------------------------------------------------
def down_block_forward(x, params, *, stride=4, dilation=1, max_time_tile=512):
    """x: (B, in_chs, T).  params hold PyTorch-layout Conv1d weights
    (Cout, Cin, k) and biases (Cout,).  Returns (out, shortcut)."""
    B, Cin, T = x.shape
    w1, w2, w3 = params["pre_w"], params["post_w"], params["down_w"]
    short_chs, _, k = w1.shape
    out_chs = w2.shape[0]

    pad1 = dilation * (k - 1) // 2          # pre / post convs ('same')
    pad3 = (k - 1) // 2                     # down conv
    assert k % 2 == 1, "fused kernel assumes an odd kernel size"
    assert T % stride == 0, "fused kernel assumes T divisible by stride"

    HS = pad1 + pad3                        # shortcut halo needed by post+down
    HX = HS + pad1                          # x halo needed by pre+post+down

    TT = _pick_time_tile(T, stride, HX, max_time_tile)
    assert HX <= TT, "halo larger than the time tile"
    nt = T // TT
    TO = TT // stride
    T3 = T // stride

    # per-tap (Cout, Cin) weights; biases as (Cout, 1) columns.
    w1k = jnp.transpose(w1, (2, 0, 1))
    w2k = jnp.transpose(w2, (2, 0, 1))
    w3k = jnp.transpose(w3, (2, 0, 1))
    b1 = params["pre_b"].reshape(short_chs, 1)
    b2 = params["post_b"].reshape(out_chs, 1)
    b3 = params["down_b"].reshape(out_chs, 1)

    kernel = functools.partial(
        _down_block_kernel, k=k, dil=dilation, stride=stride,
        TT=TT, TO=TO, HX=HX, HS=HS, P3=pad3)

    out, shortcut = pl.pallas_call(
        kernel,
        out_shape=(jax.ShapeDtypeStruct((B, out_chs, T3), x.dtype),
                   jax.ShapeDtypeStruct((B, short_chs, T), x.dtype)),
        grid=(B, nt),
        in_specs=[
            # three views of x: previous / current / next time tile (halo),
            # clamped at the sequence ends (the clamped copy is zero-masked).
            pl.BlockSpec((1, Cin, TT), lambda b, i: (b, 0, jnp.maximum(i - 1, 0))),
            pl.BlockSpec((1, Cin, TT), lambda b, i: (b, 0, i)),
            pl.BlockSpec((1, Cin, TT), lambda b, i: (b, 0, jnp.minimum(i + 1, nt - 1))),
            # weights/biases: constant block index -> DMA'd once, kept resident.
            pl.BlockSpec((k, short_chs, Cin), lambda b, i: (0, 0, 0)),
            pl.BlockSpec((short_chs, 1), lambda b, i: (0, 0)),
            pl.BlockSpec((k, out_chs, short_chs), lambda b, i: (0, 0, 0)),
            pl.BlockSpec((out_chs, 1), lambda b, i: (0, 0)),
            pl.BlockSpec((k, out_chs, out_chs), lambda b, i: (0, 0, 0)),
            pl.BlockSpec((out_chs, 1), lambda b, i: (0, 0)),
        ],
        out_specs=(
            pl.BlockSpec((1, out_chs, TO), lambda b, i: (b, 0, i)),
            pl.BlockSpec((1, short_chs, TT), lambda b, i: (b, 0, i)),
        ),
        compiler_params=pltpu.CompilerParams(
            dimension_semantics=("parallel", "parallel"),
            vmem_limit_bytes=32 * 1024 * 1024),
    )(x, x, x, w1k, b1, w2k, b2, w3k, b3)
    return out, shortcut


# ----------------------------------------------------------------------------
# Pure-JAX reference (PyTorch Conv1d semantics) + parameter init
# ----------------------------------------------------------------------------
def _conv1d_relu_ref(x, w, b, *, stride, dilation):
    k = w.shape[-1]
    pad = dilation * (k - 1) // 2
    y = jax.lax.conv_general_dilated(
        x, w, window_strides=(stride,), padding=[(pad, pad)],
        rhs_dilation=(dilation,), dimension_numbers=("NCH", "OIH", "NCH"),
        precision=jax.lax.Precision.HIGHEST)
    return jnp.maximum(y + b[None, :, None], 0.0)


def down_block_ref(x, params, *, stride=4, dilation=1):
    shortcut = _conv1d_relu_ref(x, params["pre_w"], params["pre_b"],
                                stride=1, dilation=dilation)
    out = _conv1d_relu_ref(shortcut, params["post_w"], params["post_b"],
                           stride=1, dilation=dilation)
    out = _conv1d_relu_ref(out, params["down_w"], params["down_b"],
                           stride=stride, dilation=1)
    return out, shortcut


def init_params(key, in_chs, short_chs, out_chs, k):
    ks = jax.random.split(key, 6)
    scale = 0.1
    return {
        "pre_w":  scale * jax.random.normal(ks[0], (short_chs, in_chs, k), jnp.float32),
        "pre_b":  scale * jax.random.normal(ks[1], (short_chs,), jnp.float32),
        "post_w": scale * jax.random.normal(ks[2], (out_chs, short_chs, k), jnp.float32),
        "post_b": scale * jax.random.normal(ks[3], (out_chs,), jnp.float32),
        "down_w": scale * jax.random.normal(ks[4], (out_chs, out_chs, k), jnp.float32),
        "down_b": scale * jax.random.normal(ks[5], (out_chs,), jnp.float32),
    }


if __name__ == "__main__":
    def _run_case(B, in_chs, short_chs, out_chs, T, k, stride, dilation, seed):
        kx, kp = jax.random.split(jax.random.PRNGKey(seed))
        x = jax.random.normal(kx, (B, in_chs, T), jnp.float32)
        params = init_params(kp, in_chs, short_chs, out_chs, k)
        out, short = down_block_forward(x, params, stride=stride, dilation=dilation)
        out, short = jax.block_until_ready((out, short))
        ref_out, ref_short = down_block_ref(x, params, stride=stride, dilation=dilation)
        assert out.shape == ref_out.shape, (out.shape, ref_out.shape)
        assert short.shape == ref_short.shape, (short.shape, ref_short.shape)
        err = max(float(jnp.max(jnp.abs(out - ref_out))),
                  float(jnp.max(jnp.abs(short - ref_short))))
        assert err < 5e-3, f"max abs err {err}"
        return out, short

    # 1) small shape matching the original module test (single time tile).
    out, short = _run_case(B=2, in_chs=4, short_chs=8, out_chs=16,
                           T=16, k=3, stride=4, dilation=1, seed=0)
    assert out.shape == (2, 16, 4) and short.shape == (2, 8, 16)

    # 2) longer sequence: exercises the multi-tile halo path (2 time tiles).
    _run_case(B=2, in_chs=4, short_chs=8, out_chs=16,
              T=1024, k=3, stride=4, dilation=1, seed=1)

    # 3) dilated variant of the block (dilation=2 pre/post convs).
    _run_case(B=2, in_chs=4, short_chs=8, out_chs=16,
              T=1024, k=3, stride=4, dilation=2, seed=2)

    print("KERNEL_OK")
</pallas_src>

<mosaic_0001>
module attributes {stable_mosaic.version = 11 : i64} {
  func.func @_down_block_kernel(%arg0: i32, %arg1: i32, %arg2: memref<1x4x16xf32, #tpu.memory_space<vmem>>, %arg3: memref<1x4x16xf32, #tpu.memory_space<vmem>>, %arg4: memref<1x4x16xf32, #tpu.memory_space<vmem>>, %arg5: memref<3x8x4xf32, #tpu.memory_space<vmem>>, %arg6: memref<8x1xf32, #tpu.memory_space<vmem>>, %arg7: memref<3x16x8xf32, #tpu.memory_space<vmem>>, %arg8: memref<16x1xf32, #tpu.memory_space<vmem>>, %arg9: memref<3x16x16xf32, #tpu.memory_space<vmem>>, %arg10: memref<16x1xf32, #tpu.memory_space<vmem>>, %arg11: memref<1x16x4xf32, #tpu.memory_space<vmem>>, %arg12: memref<1x8x16xf32, #tpu.memory_space<vmem>>) attributes {dimension_semantics = [#tpu.dimension_semantics<parallel>, #tpu.dimension_semantics<parallel>], iteration_bounds = array<i64: 2, 1>, scalar_prefetch = 0 : i64, scratch_operands = 0 : i64, tpu.core_type = #tpu.core_type<tc>, window_params = [{transform_indices = @transform_0, window_bounds = array<i64: 1, 4, 16>}, {transform_indices = @transform_1, window_bounds = array<i64: 1, 4, 16>}, {transform_indices = @transform_2, window_bounds = array<i64: 1, 4, 16>}, {pipeline_mode = #tpu.pipeline_mode<synchronous>, transform_indices = @transform_3, window_bounds = array<i64: 3, 8, 4>}, {pipeline_mode = #tpu.pipeline_mode<synchronous>, transform_indices = @transform_4, window_bounds = array<i64: 8, 1>}, {pipeline_mode = #tpu.pipeline_mode<synchronous>, transform_indices = @transform_5, window_bounds = array<i64: 3, 16, 8>}, {pipeline_mode = #tpu.pipeline_mode<synchronous>, transform_indices = @transform_6, window_bounds = array<i64: 16, 1>}, {pipeline_mode = #tpu.pipeline_mode<synchronous>, transform_indices = @transform_7, window_bounds = array<i64: 3, 16, 16>}, {pipeline_mode = #tpu.pipeline_mode<synchronous>, transform_indices = @transform_8, window_bounds = array<i64: 16, 1>}, {transform_indices = @transform_9, window_bounds = array<i64: 1, 16, 4>}, {transform_indices = @transform_10, window_bounds = array<i64: 1, 8, 16>}]} {
    %c0 = arith.constant 0 : index
    %c0_0 = arith.constant 0 : index
    %c0_1 = arith.constant 0 : index
    %0 = vector.load %arg3[%c0, %c0_0, %c0_1] : memref<1x4x16xf32, #tpu.memory_space<vmem>>, vector<1x4x16xf32>
    %1 = vector.shape_cast %0 : vector<1x4x16xf32> to vector<4x16xf32>
    %c0_2 = arith.constant 0 : index
    %c0_3 = arith.constant 0 : index
    %c0_4 = arith.constant 0 : index
    %2 = vector.load %arg2[%c0_2, %c0_3, %c0_4] : memref<1x4x16xf32, #tpu.memory_space<vmem>>, vector<1x4x16xf32>
    %3 = vector.shape_cast %2 : vector<1x4x16xf32> to vector<4x16xf32>
    %c0_5 = arith.constant 0 : index
    %c0_6 = arith.constant 0 : index
    %c0_7 = arith.constant 0 : index
    %4 = vector.load %arg4[%c0_5, %c0_6, %c0_7] : memref<1x4x16xf32, #tpu.memory_space<vmem>>, vector<1x4x16xf32>
    %5 = vector.shape_cast %4 : vector<1x4x16xf32> to vector<4x16xf32>
    %6 = vector.extract_strided_slice %3 {offsets = [0, 13], sizes = [4, 3], strides = [1, 1]} : vector<4x16xf32> to vector<4x3xf32>
    %7 = vector.extract_strided_slice %5 {offsets = [0, 0], sizes = [4, 3], strides = [1, 1]} : vector<4x16xf32> to vector<4x3xf32>
    %8 = tpu.concatenate %6, %1, %7 in 1 : vector<4x3xf32>, vector<4x16xf32>, vector<4x3xf32> -> vector<4x22xf32>
    %9 = tpu.iota {dimensions = array<i32: 1>} : vector<4x22xi32>
    %c0_i32 = arith.constant 0 : i32
    %10 = arith.cmpi sgt, %arg1, %c0_i32 : i32
    %c3_i32 = arith.constant 3 : i32
    %11 = vector.broadcast %c3_i32 : i32 to vector<4x22xi32>
    %12 = arith.cmpi sge, %9, %11 : vector<4x22xi32>
    %13 = vector.broadcast %10 : i1 to vector<4x22xi1>
    %14 = arith.ori %13, %12 : vector<4x22xi1>
    %c0_i32_8 = arith.constant 0 : i32
    %15 = arith.cmpi slt, %arg1, %c0_i32_8 : i32
    %c19_i32 = arith.constant 19 : i32
    %16 = vector.broadcast %c19_i32 : i32 to vector<4x22xi32>
    %17 = arith.cmpi slt, %9, %16 : vector<4x22xi32>
    %18 = vector.broadcast %15 : i1 to vector<4x22xi1>
    %19 = arith.ori %18, %17 : vector<4x22xi1>
    %20 = arith.andi %14, %19 : vector<4x22xi1>
    %cst = arith.constant 0.000000e+00 : f32
    %21 = vector.broadcast %cst : f32 to vector<4x22xf32>
    %22 = arith.select %20, %8, %21 : vector<4x22xi1>, vector<4x22xf32>
    %cst_9 = arith.constant 0.000000e+00 : f32
    %23 = vector.broadcast %cst_9 : f32 to vector<8x20xf32>
    %c0_10 = arith.constant 0 : index
    %c0_11 = arith.constant 0 : index
    %c0_12 = arith.constant 0 : index
    %24 = vector.load %arg5[%c0_10, %c0_11, %c0_12] : memref<3x8x4xf32, #tpu.memory_space<vmem>>, vector<1x8x4xf32>
    %25 = vector.shape_cast %24 : vector<1x8x4xf32> to vector<8x4xf32>
    %26 = vector.extract_strided_slice %22 {offsets = [0, 0], sizes = [4, 20], strides = [1, 1]} : vector<4x22xf32> to vector<4x20xf32>
    %cst_13 = arith.constant dense<0.000000e+00> : vector<8x20xf32>
    %27 = tpu.matmul %25, %26, %cst_13 {dimension_numbers = #tpu.dot_dimension_numbers<[1], [0], [0], [1], [0, 0, 1, 1], [], []>} : vector<8x4xf32>, vector<4x20xf32>, vector<8x20xf32> -> vector<8x20xf32>
    %28 = arith.addf %23, %27 : vector<8x20xf32>
    %c1 = arith.constant 1 : index
    %c0_14 = arith.constant 0 : index
    %c0_15 = arith.constant 0 : index
    %29 = vector.load %arg5[%c1, %c0_14, %c0_15] : memref<3x8x4xf32, #tpu.memory_space<vmem>>, vector<1x8x4xf32>
    %30 = vector.shape_cast %29 : vector<1x8x4xf32> to vector<8x4xf32>
    %31 = vector.extract_strided_slice %22 {offsets = [0, 1], sizes = [4, 20], strides = [1, 1]} : vector<4x22xf32> to vector<4x20xf32>
    %cst_16 = arith.constant dense<0.000000e+00> : vector<8x20xf32>
    %32 = tpu.matmul %30, %31, %cst_16 {dimension_numbers = #tpu.dot_dimension_numbers<[1], [0], [0], [1], [0, 0, 1, 1], [], []>} : vector<8x4xf32>, vector<4x20xf32>, vector<8x20xf32> -> vector<8x20xf32>
    %33 = arith.addf %28, %32 : vector<8x20xf32>
    %c2 = arith.constant 2 : index
    %c0_17 = arith.constant 0 : index
    %c0_18 = arith.constant 0 : index
    %34 = vector.load %arg5[%c2, %c0_17, %c0_18] : memref<3x8x4xf32, #tpu.memory_space<vmem>>, vector<1x8x4xf32>
    %35 = vector.shape_cast %34 : vector<1x8x4xf32> to vector<8x4xf32>
    %36 = vector.extract_strided_slice %22 {offsets = [0, 2], sizes = [4, 20], strides = [1, 1]} : vector<4x22xf32> to vector<4x20xf32>
    %cst_19 = arith.constant dense<0.000000e+00> : vector<8x20xf32>
    %37 = tpu.matmul %35, %36, %cst_19 {dimension_numbers = #tpu.dot_dimension_numbers<[1], [0], [0], [1], [0, 0, 1, 1], [], []>} : vector<8x4xf32>, vector<4x20xf32>, vector<8x20xf32> -> vector<8x20xf32>
    %38 = arith.addf %33, %37 : vector<8x20xf32>
    %c0_20 = arith.constant 0 : index
    %c0_21 = arith.constant 0 : index
    %39 = vector.load %arg6[%c0_20, %c0_21] : memref<8x1xf32, #tpu.memory_space<vmem>>, vector<8x1xf32>
    %40 = vector.broadcast %39 : vector<8x1xf32> to vector<8x20xf32>
    %41 = arith.addf %38, %40 : vector<8x20xf32>
    %cst_22 = arith.constant 0.000000e+00 : f32
    %42 = vector.broadcast %cst_22 : f32 to vector<8x20xf32>
    %43 = arith.maximumf %41, %42 : vector<8x20xf32>
    %44 = tpu.iota {dimensions = array<i32: 1>} : vector<8x20xi32>
    %c0_i32_23 = arith.constant 0 : i32
    %45 = arith.cmpi sgt, %arg1, %c0_i32_23 : i32
    %c2_i32 = arith.constant 2 : i32
    %46 = vector.broadcast %c2_i32 : i32 to vector<8x20xi32>
    %47 = arith.cmpi sge, %44, %46 : vector<8x20xi32>
    %48 = vector.broadcast %45 : i1 to vector<8x20xi1>
    %49 = arith.ori %48, %47 : vector<8x20xi1>
    %c0_i32_24 = arith.constant 0 : i32
    %50 = arith.cmpi slt, %arg1, %c0_i32_24 : i32
    %c18_i32 = arith.constant 18 : i32
    %51 = vector.broadcast %c18_i32 : i32 to vector<8x20xi32>
    %52 = arith.cmpi slt, %44, %51 : vector<8x20xi32>
    %53 = vector.broadcast %50 : i1 to vector<8x20xi1>
    %54 = arith.ori %53, %52 : vector<8x20xi1>
    %55 = arith.andi %49, %54 : vector<8x20xi1>
    %cst_25 = arith.constant 0.000000e+00 : f32
    %56 = vector.broadcast %cst_25 : f32 to vector<8x20xf32>
    %57 = arith.select %55, %43, %56 : vector<8x20xi1>, vector<8x20xf32>
    %58 = vector.extract_strided_slice %57 {offsets = [0, 2], sizes = [8, 16], strides = [1, 1]} : vector<8x20xf32> to vector<8x16xf32>
    %c0_26 = arith.constant 0 : index
    %c0_27 = arith.constant 0 : index
    %c0_28 = arith.constant 0 : index
    %59 = vector.load %arg12[%c0_26, %c0_27, %c0_28] : memref<1x8x16xf32, #tpu.memory_space<vmem>>, vector<1x8x16xf32>
    %60 = vector.shape_cast %59 : vector<1x8x16xf32> to vector<8x16xf32>
    %61 = vector.shape_cast %58 : vector<8x16xf32> to vector<1x8x16xf32>
    tpu.vector_store %arg12[%c0_26, %c0_27, %c0_28], %61 {strides = array<i32>} : memref<1x8x16xf32, #tpu.memory_space<vmem>>, vector<1x8x16xf32>,
    %cst_29 = arith.constant 0.000000e+00 : f32
    %62 = vector.broadcast %cst_29 : f32 to vector<16x18xf32>
    %c0_30 = arith.constant 0 : index
    %c0_31 = arith.constant 0 : index
    %c0_32 = arith.constant 0 : index
    %63 = vector.load %arg7[%c0_30, %c0_31, %c0_32] : memref<3x16x8xf32, #tpu.memory_space<vmem>>, vector<1x16x8xf32>
    %64 = vector.shape_cast %63 : vector<1x16x8xf32> to vector<16x8xf32>
    %65 = vector.extract_strided_slice %57 {offsets = [0, 0], sizes = [8, 18], strides = [1, 1]} : vector<8x20xf32> to vector<8x18xf32>
    %cst_33 = arith.constant dense<0.000000e+00> : vector<16x18xf32>
    %66 = tpu.matmul %64, %65, %cst_33 {dimension_numbers = #tpu.dot_dimension_numbers<[1], [0], [0], [1], [0, 0, 1, 1], [], []>} : vector<16x8xf32>, vector<8x18xf32>, vector<16x18xf32> -> vector<16x18xf32>
    %67 = arith.addf %62, %66 : vector<16x18xf32>
    %c1_34 = arith.constant 1 : index
    %c0_35 = arith.constant 0 : index
    %c0_36 = arith.constant 0 : index
    %68 = vector.load %arg7[%c1_34, %c0_35, %c0_36] : memref<3x16x8xf32, #tpu.memory_space<vmem>>, vector<1x16x8xf32>
    %69 = vector.shape_cast %68 : vector<1x16x8xf32> to vector<16x8xf32>
    %70 = vector.extract_strided_slice %57 {offsets = [0, 1], sizes = [8, 18], strides = [1, 1]} : vector<8x20xf32> to vector<8x18xf32>
    %cst_37 = arith.constant dense<0.000000e+00> : vector<16x18xf32>
    %71 = tpu.matmul %69, %70, %cst_37 {dimension_numbers = #tpu.dot_dimension_numbers<[1], [0], [0], [1], [0, 0, 1, 1], [], []>} : vector<16x8xf32>, vector<8x18xf32>, vector<16x18xf32> -> vector<16x18xf32>
    %72 = arith.addf %67, %71 : vector<16x18xf32>
    %c2_38 = arith.constant 2 : index
    %c0_39 = arith.constant 0 : index
    %c0_40 = arith.constant 0 : index
    %73 = vector.load %arg7[%c2_38, %c0_39, %c0_40] : memref<3x16x8xf32, #tpu.memory_space<vmem>>, vector<1x16x8xf32>
    %74 = vector.shape_cast %73 : vector<1x16x8xf32> to vector<16x8xf32>
    %75 = vector.extract_strided_slice %57 {offsets = [0, 2], sizes = [8, 18], strides = [1, 1]} : vector<8x20xf32> to vector<8x18xf32>
    %cst_41 = arith.constant dense<0.000000e+00> : vector<16x18xf32>
    %76 = tpu.matmul %74, %75, %cst_41 {dimension_numbers = #tpu.dot_dimension_numbers<[1], [0], [0], [1], [0, 0, 1, 1], [], []>} : vector<16x8xf32>, vector<8x18xf32>, vector<16x18xf32> -> vector<16x18xf32>
    %77 = arith.addf %72, %76 : vector<16x18xf32>
    %c0_42 = arith.constant 0 : index
    %c0_43 = arith.constant 0 : index
    %78 = vector.load %arg8[%c0_42, %c0_43] : memref<16x1xf32, #tpu.memory_space<vmem>>, vector<16x1xf32>
    %79 = vector.broadcast %78 : vector<16x1xf32> to vector<16x18xf32>
    %80 = arith.addf %77, %79 : vector<16x18xf32>
    %cst_44 = arith.constant 0.000000e+00 : f32
    %81 = vector.broadcast %cst_44 : f32 to vector<16x18xf32>
    %82 = arith.maximumf %80, %81 : vector<16x18xf32>
    %83 = tpu.iota {dimensions = array<i32: 1>} : vector<16x18xi32>
    %c0_i32_45 = arith.constant 0 : i32
    %84 = arith.cmpi sgt, %arg1, %c0_i32_45 : i32
    %c1_i32 = arith.constant 1 : i32
    %85 = vector.broadcast %c1_i32 : i32 to vector<16x18xi32>
    %86 = arith.cmpi sge, %83, %85 : vector<16x18xi32>
    %87 = vector.broadcast %84 : i1 to vector<16x18xi1>
    %88 = arith.ori %87, %86 : vector<16x18xi1>
    %c0_i32_46 = arith.constant 0 : i32
    %89 = arith.cmpi slt, %arg1, %c0_i32_46 : i32
    %c17_i32 = arith.constant 17 : i32
    %90 = vector.broadcast %c17_i32 : i32 to vector<16x18xi32>
    %91 = arith.cmpi slt, %83, %90 : vector<16x18xi32>
    %92 = vector.broadcast %89 : i1 to vector<16x18xi1>
    %93 = arith.ori %92, %91 : vector<16x18xi1>
    %94 = arith.andi %88, %93 : vector<16x18xi1>
    %cst_47 = arith.constant 0.000000e+00 : f32
    %95 = vector.broadcast %cst_47 : f32 to vector<16x18xf32>
    %96 = arith.select %94, %82, %95 : vector<16x18xi1>, vector<16x18xf32>
    %cst_48 = arith.constant 0.000000e+00 : f32
    %97 = vector.broadcast %cst_48 : f32 to vector<16x16xf32>
    %c0_49 = arith.constant 0 : index
    %c0_50 = arith.constant 0 : index
    %c0_51 = arith.constant 0 : index
    %98 = vector.load %arg9[%c0_49, %c0_50, %c0_51] : memref<3x16x16xf32, #tpu.memory_space<vmem>>, vector<1x16x16xf32>
    %99 = vector.shape_cast %98 : vector<1x16x16xf32> to vector<16x16xf32>
    %100 = vector.extract_strided_slice %96 {offsets = [0, 0], sizes = [16, 16], strides = [1, 1]} : vector<16x18xf32> to vector<16x16xf32>
    %cst_52 = arith.constant dense<0.000000e+00> : vector<16x16xf32>
    %101 = tpu.matmul %99, %100, %cst_52 {dimension_numbers = #tpu.dot_dimension_numbers<[1], [0], [0], [1], [0, 0, 1, 1], [], []>} : vector<16x16xf32>, vector<16x16xf32>, vector<16x16xf32> -> vector<16x16xf32>
    %102 = arith.addf %97, %101 : vector<16x16xf32>
    %c1_53 = arith.constant 1 : index
    %c0_54 = arith.constant 0 : index
    %c0_55 = arith.constant 0 : index
    %103 = vector.load %arg9[%c1_53, %c0_54, %c0_55] : memref<3x16x16xf32, #tpu.memory_space<vmem>>, vector<1x16x16xf32>
    %104 = vector.shape_cast %103 : vector<1x16x16xf32> to vector<16x16xf32>
    %105 = vector.extract_strided_slice %96 {offsets = [0, 1], sizes = [16, 16], strides = [1, 1]} : vector<16x18xf32> to vector<16x16xf32>
    %cst_56 = arith.constant dense<0.000000e+00> : vector<16x16xf32>
    %106 = tpu.matmul %104, %105, %cst_56 {dimension_numbers = #tpu.dot_dimension_numbers<[1], [0], [0], [1], [0, 0, 1, 1], [], []>} : vector<16x16xf32>, vector<16x16xf32>, vector<16x16xf32> -> vector<16x16xf32>
    %107 = arith.addf %102, %106 : vector<16x16xf32>
    %c2_57 = arith.constant 2 : index
    %c0_58 = arith.constant 0 : index
    %c0_59 = arith.constant 0 : index
    %108 = vector.load %arg9[%c2_57, %c0_58, %c0_59] : memref<3x16x16xf32, #tpu.memory_space<vmem>>, vector<1x16x16xf32>
    %109 = vector.shape_cast %108 : vector<1x16x16xf32> to vector<16x16xf32>
    %110 = vector.extract_strided_slice %96 {offsets = [0, 2], sizes = [16, 16], strides = [1, 1]} : vector<16x18xf32> to vector<16x16xf32>
    %cst_60 = arith.constant dense<0.000000e+00> : vector<16x16xf32>
    %111 = tpu.matmul %109, %110, %cst_60 {dimension_numbers = #tpu.dot_dimension_numbers<[1], [0], [0], [1], [0, 0, 1, 1], [], []>} : vector<16x16xf32>, vector<16x16xf32>, vector<16x16xf32> -> vector<16x16xf32>
    %112 = arith.addf %107, %111 : vector<16x16xf32>
    %113 = tpu.iota {dimensions = array<i32: 0>} : vector<16x4xi32>
    %114 = tpu.iota {dimensions = array<i32: 1>} : vector<16x4xi32>
    %c4_i32 = arith.constant 4 : i32
    %115 = vector.broadcast %c4_i32 : i32 to vector<16x4xi32>
    %116 = arith.muli %114, %115 : vector<16x4xi32>
    %117 = arith.cmpi eq, %113, %116 : vector<16x4xi32>
    %118 = arith.extui %117 : vector<16x4xi1> to vector<16x4xi32>
    %119 = arith.sitofp %118 : vector<16x4xi32> to vector<16x4xf32>
    %cst_61 = arith.constant dense<0.000000e+00> : vector<16x4xf32>
    %120 = tpu.matmul %112, %119, %cst_61 {dimension_numbers = #tpu.dot_dimension_numbers<[1], [0], [0], [1], [0, 0, 1, 1], [], []>} : vector<16x16xf32>, vector<16x4xf32>, vector<16x4xf32> -> vector<16x4xf32>
    %c0_62 = arith.constant 0 : index
    %c0_63 = arith.constant 0 : index
    %121 = vector.load %arg10[%c0_62, %c0_63] : memref<16x1xf32, #tpu.memory_space<vmem>>, vector<16x1xf32>
    %122 = vector.broadcast %121 : vector<16x1xf32> to vector<16x4xf32>
    %123 = arith.addf %120, %122 : vector<16x4xf32>
    %cst_64 = arith.constant 0.000000e+00 : f32
    %124 = vector.broadcast %cst_64 : f32 to vector<16x4xf32>
    %125 = arith.maximumf %123, %124 : vector<16x4xf32>
    %c0_65 = arith.constant 0 : index
    %c0_66 = arith.constant 0 : index
    %c0_67 = arith.constant 0 : index
    %126 = vector.load %arg11[%c0_65, %c0_66, %c0_67] : memref<1x16x4xf32, #tpu.memory_space<vmem>>, vector<1x16x4xf32>
    %127 = vector.shape_cast %126 : vector<1x16x4xf32> to vector<16x4xf32>
    %128 = vector.shape_cast %125 : vector<16x4xf32> to vector<1x16x4xf32>
    tpu.vector_store %arg11[%c0_65, %c0_66, %c0_67], %128 {strides = array<i32>} : memref<1x16x4xf32, #tpu.memory_space<vmem>>, vector<1x16x4xf32>,
    return
  }
  func.func @transform_0(%arg0: i32, %arg1: i32) -> (i32, i32, i32) {
    %c1_i32 = arith.constant 1 : i32
    %0 = arith.subi %arg1, %c1_i32 : i32
    %c0_i32 = arith.constant 0 : i32
    %1 = arith.maxsi %0, %c0_i32 : i32
    %c0_i32_0 = arith.constant 0 : i32
    %c0_i32_1 = arith.constant 0 : i32
    return %arg0, %c0_i32_0, %1 : i32, i32, i32
  }
  func.func @transform_1(%arg0: i32, %arg1: i32) -> (i32, i32, i32) {
    %c0_i32 = arith.constant 0 : i32
    %c0_i32_0 = arith.constant 0 : i32
    return %arg0, %c0_i32, %arg1 : i32, i32, i32
  }
  func.func @transform_2(%arg0: i32, %arg1: i32) -> (i32, i32, i32) {
    %c1_i32 = arith.constant 1 : i32
    %0 = arith.addi %arg1, %c1_i32 : i32
    %c0_i32 = arith.constant 0 : i32
    %1 = arith.minsi %0, %c0_i32 : i32
    %c0_i32_0 = arith.constant 0 : i32
    %c0_i32_1 = arith.constant 0 : i32
    return %arg0, %c0_i32_0, %1 : i32, i32, i32
  }
  func.func @transform_3(%arg0: i32, %arg1: i32) -> (i32, i32, i32) {
    %c0_i32 = arith.constant 0 : i32
    %c0_i32_0 = arith.constant 0 : i32
    %c0_i32_1 = arith.constant 0 : i32
    %c0_i32_2 = arith.constant 0 : i32
    return %c0_i32, %c0_i32_0, %c0_i32_1 : i32, i32, i32
  }
  func.func @transform_4(%arg0: i32, %arg1: i32) -> (i32, i32) {
    %c0_i32 = arith.constant 0 : i32
    %c0_i32_0 = arith.constant 0 : i32
    %c0_i32_1 = arith.constant 0 : i32
    return %c0_i32, %c0_i32_0 : i32, i32
  }
  func.func @transform_5(%arg0: i32, %arg1: i32) -> (i32, i32, i32) {
    %c0_i32 = arith.constant 0 : i32
    %c0_i32_0 = arith.constant 0 : i32
    %c0_i32_1 = arith.constant 0 : i32
    %c0_i32_2 = arith.constant 0 : i32
    return %c0_i32, %c0_i32_0, %c0_i32_1 : i32, i32, i32
  }
  func.func @transform_6(%arg0: i32, %arg1: i32) -> (i32, i32) {
    %c0_i32 = arith.constant 0 : i32
    %c0_i32_0 = arith.constant 0 : i32
    %c0_i32_1 = arith.constant 0 : i32
    return %c0_i32, %c0_i32_0 : i32, i32
  }
  func.func @transform_7(%arg0: i32, %arg1: i32) -> (i32, i32, i32) {
    %c0_i32 = arith.constant 0 : i32
    %c0_i32_0 = arith.constant 0 : i32
    %c0_i32_1 = arith.constant 0 : i32
    %c0_i32_2 = arith.constant 0 : i32
    return %c0_i32, %c0_i32_0, %c0_i32_1 : i32, i32, i32
  }
  func.func @transform_8(%arg0: i32, %arg1: i32) -> (i32, i32) {
    %c0_i32 = arith.constant 0 : i32
    %c0_i32_0 = arith.constant 0 : i32
    %c0_i32_1 = arith.constant 0 : i32
    return %c0_i32, %c0_i32_0 : i32, i32
  }
  func.func @transform_9(%arg0: i32, %arg1: i32) -> (i32, i32, i32) {
    %c0_i32 = arith.constant 0 : i32
    %c0_i32_0 = arith.constant 0 : i32
    return %arg0, %c0_i32, %arg1 : i32, i32, i32
  }
  func.func @transform_10(%arg0: i32, %arg1: i32) -> (i32, i32, i32) {
    %c0_i32 = arith.constant 0 : i32
    %c0_i32_0 = arith.constant 0 : i32
    return %arg0, %c0_i32, %arg1 : i32, i32, i32
  }
}

</mosaic_0001>

<bundles_post_ra>
// kernel: tpu_custom_call.1
= control target key start
LH: loop header
LB: loop body
LE: loop exit
PB: predicated region body
PF: predicated region fallthrough
CT: control target
= control target key end

     0   :  { %16 = vsyncpa [#allocation3], 0  ;;  %s2252_s0 = inlined_call_operand.vmem [shape: f32[2,4,16], index: 0, kind: input, shape index: {}]   ;;  %s2253_s1 = inlined_call_operand.vmem [shape: f32[2,4,16], index: 1, kind: input, shape index: {}]   ;;  %s2254_s2 = inlined_call_operand.vmem [shape: f32[2,4,16], index: 2, kind: input, shape index: {}]   ;;  %s2255_s3 = inlined_call_operand.vmem [shape: f32[3,8,4], index: 3, kind: input, shape index: {}]   ;;  %s2256_s4 = inlined_call_operand.vmem [shape: f32[8,1], index: 4, kind: input, shape index: {}]   ;;  %s2257_s5 = inlined_call_operand.vmem [shape: f32[3,16,8], index: 5, kind: input, shape index: {}]   ;;  %s2258_s6 = inlined_call_operand.vmem [shape: f32[16,1], index: 6, kind: input, shape index: {}]   ;;  %s2259_s7 = inlined_call_operand.vmem [shape: f32[3,16,16], index: 7, kind: input, shape index: {}]   ;;  %s2260_s8 = inlined_call_operand.vmem [shape: f32[16,1], index: 8, kind: input, shape index: {}]   ;;  %s2261_s9 = inlined_call_operand.vmem [shape: f32[2,16,4], index: 9, kind: output, shape index: {0}]   ;;  %s2262_s10 = inlined_call_operand.hbm [shape: f32[2,8,16], index: 10, kind: output, shape index: {1}]  }
   0x1   :  { %18 = vsyncpa [#allocation3 + $0x1], 0  ;;  %s1998_s13 = smov 0   ;;  %s2000_s14 = smov 0  }
   0x2   :  { %s2002_s15 = smov 0   ;;  %s2004_s16 = smov 0  }
   0x3   :  { %s2006_s17 = smov 0   ;;  %s2008_s18 = smov 0  }
   0x4 LB: > { %2266 = sst [smem:[#allocation5_spill]] %s1919_s15  ;;  %s1609_s19 = sadd.s32 4294967295, %s1931_s18   ;;  %s1931_s18 = sphi %s2008_s18, %s24_s18   ;;  %s1927_s17 = sphi %s2006_s17, %s2279_s17   ;;  %s1923_s16 = sphi %s2004_s16, %s2278_s16   ;;  %s1919_s15 = sphi %s2002_s15, %s2277_s15   ;;  %s1915_s14 = sphi %s2000_s14, %s2281_s14   ;;  %s1911_s13 = sphi %s1998_s13, %s2280_s13  }
   0x5   : > { %2267 = sst [smem:[#allocation6_spill]] %s1927_s17  ;;  %s1610_s20 = sadd.s32 4294967294, %s1931_s18  }
   0x6   : > { %s36_s21 = sadd.s32 1, %s1927_s17  ;;  %s295_s22 = sadd.s32 1, %s1919_s15 }
   0x7   : > { %p38_p0 = scmp.ge.s32.totalorder %s36_s21, 2  ;;  %p305_p1 = scmp.ne.s32.totalorder %s1919_s15, %s1915_s14 }
   0x8   : > { %p306_p2 = scmp.eq.s32.totalorder %s1609_s19, 1  ;;  %p311_p3 = scmp.ne.s32.totalorder %s1915_s14, %s1911_s13 }
   0x9   : > { %s2283_s21 = smov (%p38_p0, %s36_s21), 0  ;;  %p312_p5 = scmp.eq.s32.totalorder %s1610_s20, 1 }
   0xa   : > { %2268 = sst [smem:[#allocation7_spill]] %s2283_s21  ;;  %p2038_p4 = por %p306_p2, %p305_p1 }
   0xb   : > { %s290_s24 = ssub.s32 %s1927_s17, %s2283_s21  ;;  %p1613_p6 = scmp.ge.s32.totalorder %s1931_s18, 1 }
   0xc   : > { %p293_p7 = scmp.eq.s32.totalorder %s290_s24, 0  ;;  %p2045_p8 = por %p312_p5, %p311_p3 }
   0xd   : > { %p390_p9 = scmp.lt.s32.totalorder %s1931_s18, 3 }
   0xe   : > { %s2051_s26 = scalar_select %p293_p7, %s1919_s15, %s295_s22  }
   0xf   : > { %p391_p10 = pnand %p1613_p6, %p390_p9 }
  0x10   : > { %2271 = sst [smem:[#allocation8_spill]] %s2051_s26  ;;  %p461_p11 = scmp.lt.s32.totalorder (!%p391_p10), %s1923_s16, 1  ;;  %v1933_v0 = vmov (!%p391_p10), 0.0   ;;  %v518_v4 = vlaneseq (!%p391_p10)  ;;  %vm1937_vm0 = vmmov (!%p391_p10), 0   ;;  %v1938_v7 = vmov (!%p391_p10), 0   ;;  %v534_v13 = vld [vmem:[%s2255_s3] sm:$0xff] (!%p391_p10) }
  0x11   : > { %394 = sbr.rel (%p391_p10) target bundleno = 1414 (0x586), region = 56  ;;  %1698 = vmatprep.subr.mxu1 (!%p391_p10), %v1933_v0  ;;  %1693 = vmatprep.subr.mxu0 (!%p391_p10), %v1933_v0  ;;  %s1934_s17 = smov (!%p391_p10), 115   ;;  %vm514_vm3 = vcmask (!%p391_p10), 23552   ;;  %vm516_vm4 = vcmask (!%p391_p10), 154624   ;;  %vm544_vm6 = vcmask (!%p391_p10), 1043456   ;;  %vm540_vm7 = vcmask (!%p391_p10), 31744  }
  0x12   : > { %s1935_s26 = smov (!%p391_p10), 19   ;;  %s1936_s15 = smov (!%p391_p10), 3   ;;  %1695 = vmatprep.mubr.msk.f32.mxu0 (!%p391_p10), %vm1937_vm0, %v1933_v0  ;;  %1700 = vmatprep.mubr.msk.f32.mxu1 (!%p391_p10), %vm1937_vm0, %v1933_v0  ;;  %v2070_v5 = vand.u32 (!%p391_p10), 127, %v518_v4  ;;  %v772_v14 = vld [vmem:[%s2256_s4] sm:$0xff] (!%p391_p10)  ;;  %v1620_v15 = vld [vmem:[%s2255_s3 + $0x8] sm:$0xff] (!%p391_p10)  ;;  %v1625_v18 = vld [vmem:[%s2255_s3 + $0x10] sm:$0xff] (!%p391_p10) }
  0x13   : > { %1841 = vset.pattern.permute.xlu1 (!%p391_p10), %v1938_v7  ;;  %1842 = vset.pattern.permute.xlu0 (!%p391_p10), %v1938_v7  ;;  %v1628_v22 = vld [vmem:[%s2257_s5 + $0x10] sm:$0xff] (!%p391_p10)  ;;  %vm800_vm8 = vcmask (!%p391_p10), 64512   ;;  %v1050_v33 = vld [vmem:[%s2258_s6 + $0x8] sm:$0xff] (!%p391_p10)  ;;  %v1049_v34 = vld [vmem:[%s2258_s6] sm:$0xff] (!%p391_p10)  ;;  %s455_s29 = sand.u32 (!%p391_p10), 1, %s1915_s14   ;;  %vm790_vm12 = vcmask (!%p391_p10), 130048  }
  0x14   : > { %vm521_vm1 = vcmp.ge.s32.totalorder (!%p391_p10), %v2070_v5, 3  ;;  %vm527_vm2 = vcmp.lt.s32.totalorder (!%p391_p10), %v2070_v5, 19  ;;  %vm780_vm9 = vcmp.ge.s32.totalorder (!%p391_p10), %v2070_v5, 2  ;;  %vm782_vm10 = vcmp.lt.s32.totalorder (!%p391_p10), %v2070_v5, 18  ;;  %s2118_s30 = sshll.u32 (!%p391_p10), %s455_s29, 3  ;;  %v1629_v37 = vld [vmem:[%s2257_s5 + $0x18] sm:$0xff] (!%p391_p10) }
  0x15   : > { %vm532_vm5 = vmand (!%p391_p10), %vm521_vm1, %vm527_vm2  ;;  %v792_v38 = vld [vmem:[%s2257_s5] sm:$0xff] (!%p391_p10)  ;;  %s457_s22 = scalar_lea.vmem (!%p391_p10), [#allocation2], %s2118_s30  ;;  %v793_v39 = vld [vmem:[%s2257_s5 + $0x8] sm:$0xff] (!%p391_p10)  ;;  %vm1065_vm13 = vcmp.ge.s32.totalorder (!%p391_p10), %v2070_v5, 1  ;;  %vm1067_vm14 = vcmp.lt.s32.totalorder (!%p391_p10), %v2070_v5, 17  ;;  %v1340_v58 = vshrl.u32 (!%p391_p10), %v518_v4, 7 }
  0x16   : > { %vm2101_vm11 = vmand (!%p391_p10), %vm780_vm9, %vm782_vm10  ;;  %v1635_v40 = vld [vmem:[%s2257_s5 + $0x20] sm:$0xff] (!%p391_p10)  ;;  %v1636_v41 = vld [vmem:[%s2257_s5 + $0x28] sm:$0xff] (!%p391_p10)  ;;  %v1342_v59 = vmul.u32 (!%p391_p10), 4, %v2070_v5  ;;  %v1941_v61 = vmov (!%p391_p10), 1.0|1.0  }
  0x17   : > { %vm2150_vm15 = vmand (!%p391_p10), %vm1065_vm13, %vm1067_vm14  ;;  %v1639_v49 = vld [vmem:[%s2259_s7 + $0x10] sm:$0xff] (!%p391_p10)  ;;  %v1350_v56 = vld [vmem:[%s2260_s8 + $0x8] sm:$0xff] (!%p391_p10)  ;;  %v1341_v60 = vadd.s32 (!%p391_p10), 8, %v1340_v58 }
  0x18   : > { %s2055_s27 = scalar_select %p461_p11, %s1923_s16, 1  ;;  %v1349_v57 = vld [vmem:[%s2260_s8] sm:$0xff]  ;;  %v1640_v5 = vld [vmem:[%s2259_s7 + $0x18] sm:$0xff] }
  0x19   : > { %vm1344_vm1 = vcmp.eq.s32.totalorder %v1341_v60, %v1342_v59 }
  0x1a   : > { %s1615_s28 = sshll.u32 %s2055_s27, 2 }
  0x1b   : > { %s467_s11 = scalar_lea.vmem %s2252_s0, %s1615_s28  ;;  %s477_s20 = scalar_lea.vmem %s2253_s1, %s1615_s28 }
  0x1c   : > { %v500_v1 = vld [vmem:[%s467_s11] sm:$0xf]  ;;  %s487_s21 = scalar_lea.vmem %s2254_s2, %s1615_s28 }
  0x1d   : > { %503 = vrot.lane.b32.xlu0 %v500_v1, %s1934_s17  ;;  %v501_v2 = vld [vmem:[%s487_s21] sm:$0xf]  ;;  %s1939_s21 = smov 126  }
  0x1e   : > { %v499_v3 = vld [vmem:[%s477_s20] sm:$0xf]  ;;  %511 = vrot.lane.b32.xlu1 %v501_v2, %s1935_s26  ;;  %s1940_s26 = smov 127   ;;  %s1455_s20 = scalar_lea.sflag [#allocation3], %s455_s29 }
  0x21   : > { %507 = vrot.lane.b32.xlu0 %v499_v3, %s1936_s15  ;;  %s1942_s15 = smov [#allocation2]  }
  0x22   : > { %s1857_s17 = sshll.u32 %s1942_s15, 4  ;;  %s1858_s17 = int_to_ptr.vmem [resolvable:$false] %s1857_s17 }
  0x23   : > { %s1859_s28 = scalar_lea.vmem %s1858_s17, 256 }
  0x8f   : > { %v504_v6 = vpop.permute.xlu0 %503 }
  0x90   : > { %v512_v8 = vpop.permute.xlu1 %511 }
  0x93   : > { %v508_v9 = vpop.permute.xlu0 %507 }
  0x94   : > { %v515_v10 = vsel %vm514_vm3, %v504_v6, %v508_v9  ;;  %vm1756_vm3 = vmpackc.low %vm2150_vm15, %vm2150_vm15  ;;  %v1072_v6 = vld [vmem:[%s2259_s7] sm:$0xff] }
  0x95   : > { %v517_v11 = vsel %vm516_vm4, %v515_v10, %v512_v8  ;;  %v1073_v8 = vld [vmem:[%s2259_s7 + $0x8] sm:$0xff]  ;;  %v1647_v9 = vld [vmem:[%s2259_s7 + $0x20] sm:$0xff] }
  0x96   : > { %v533_v12 = vsel %vm532_vm5, %v517_v11, 0.0  ;;  %v1648_v10 = vld [vmem:[%s2259_s7 + $0x28] sm:$0xff] }
  0x97   : > { %694 = vrot.lane.b32.xlu0 %v533_v12, %s1939_s21  ;;  %538 = vrot.lane.b32.xlu1 %v533_v12, %s1940_s26 }
  0x98   : > { %1699 = vmatpush3.msk.msra.mxu1 %vm544_vm6, %v533_v12 }
  0x99   : > { %1701 = vmatmul.mubr.msk.f32.vlgmr.msra.gmra.mrb[0].mxu1 %vm540_vm7, %v534_v13 }
  0x9a   : > { %1710 = vmatprep.mubr.msk.f32.mxu1 %vm800_vm8, %v1628_v22 }
  0x9b   : > { %775 = vperm.xlu1 %1841, %v772_v14  }
 0x109   : > { %v539_v16 = vpop.permute.xlu1 %538  ;;  %v695_v17 = vpop.permute.xlu0 %694 }
 0x10a   : > { %1694 = vmatpush3.msk.msra.mxu0 %vm544_vm6, %v539_v16 }
 0x10b   : > { %1696 = vmatmul.mubr.msk.f32.vlgmr.msra.gmra.mrb[0].mxu0 %vm540_vm7, %v1620_v15  ;;  %1703 = vmatprep.subr.mxu0 %v1933_v0 }
 0x10c   : > { %1704 = vmatpush3.msk.msra.mxu0 %vm544_vm6, %v695_v17  ;;  %1705 = vmatprep.mubr.msk.f32.mxu0 %vm1937_vm0, %v1933_v0  ;;  %vm1343_vm0 = vcmp.eq.s32.totalorder %v1340_v58, %v1342_v59 }
 0x10d   : > { %vm1765_vm2 = vmpackc.low %vm1344_vm1, %vm1343_vm0 }
 0x10f   : > { %1706 = vmatmul.mubr.msk.f32.vlgmr.msra.gmra.mrb[2].mxu0 %vm540_vm7, %v1625_v18 }
 0x110   : > { %1727 = vmatprep.mubr.msk.f32.mxu0 %vm790_vm12, %v1639_v49 }
 0x11a   : > { %v776_v26 = vpop.permute.xlu1 %775 }
 0x16c   : > { %v688_v19 = vpop.f32.mrb[0].mxu1 }
 0x16d   : > { %v1702_v20 = vpop.f32.mrb[1].mxu1 }
 0x1de   : > { %v613_v21 = vpop.f32.mrb[0].mxu0 }
 0x1df   : > { %v689_v23 = vadd.f32 %v688_v19, %v613_v21  ;;  %v1697_v24 = vpop.f32.mrb[1].mxu0 }
 0x1e2   : > { %v767_v25 = vpop.f32.mrb[2].mxu0 }
 0x1e3   : > { %v771_v27 = vadd.f32 %v767_v25, %v689_v23  ;;  %v1707_v28 = vpop.f32.mrb[3].mxu0 }
 0x1e5   : > { %v778_v29 = vadd.f32 %v776_v26, %v771_v27 }
 0x1e7   : > { %v779_v31 = vmax.f32 %v778_v29, 0.0 }
 0x1e9   : > { %v785_v32 = vsel %vm2101_vm11, %v779_v31, 0.0 }
 0x1ea   : > { %787 = vrot.lane.b32.xlu1 %v785_v32, %s1939_s21  ;;  %797 = vrot.lane.b32.xlu0 %v785_v32, %s1940_s26 }
 0x1ee   : > { %1058 = vperm.xlu1 %1841, %v1050_v33   ;;  %1053 = vperm.xlu0 %1842, %v1049_v34  }
 0x25c   : > { %v788_v35 = vpop.permute.xlu1 %787  ;;  %v798_v36 = vpop.permute.xlu0 %797 }
 0x25d   : > { %1708 = vmatprep.subr.mxu1 %v798_v36  ;;  %791 = vst.msk [vmem:[%s457_s22] sm:$0xff] %vm790_vm12, %v788_v35 }
 0x25e   : > { %1709 = vmatpush3.msra.mxu1 %v798_v36 }
 0x25f   : > { %1711 = vmatmul.mubr.msk.f32.vlgmr.msra.gmra.mrb[2].mxu1 %vm800_vm8, %v1629_v37  ;;  %1713 = vmatprep.subr.msk.mxu1 %vm2101_vm11, %v779_v31 }
 0x260   : > { %1714 = vmatpush3.msk.msra.mxu1 %vm2101_vm11, %v779_v31  ;;  %1715 = vmatprep.mubr.msk.f32.mxu1 %vm800_vm8, %v792_v38 }
 0x261   : > { %1718 = vmatprep.subr.mxu1 %v788_v35 }
 0x267   : > { %1716 = vmatmul.mubr.msk.f32.vlgmr.msra.gmra.mrb[2].mxu1 %vm800_vm8, %v793_v39 }
 0x268   : > { %1719 = vmatpush3.msra.mxu1 %v788_v35  ;;  %1720 = vmatprep.mubr.msk.f32.mxu1 %vm800_vm8, %v1635_v40 }
 0x269   : > { %1766 = vmatprep.subr.msk.bf16.mxu1 %vm1765_vm2, %v1941_v61 }
 0x26d   : > { %v1054_v42 = vpop.permute.xlu0 %1053  ;;  %v1059_v43 = vpop.permute.xlu1 %1058 }
 0x26f   : > { %1721 = vmatmul.mubr.msk.f32.vlgmr.msra.gmra.mrb[2].mxu1 %vm800_vm8, %v1636_v41 }
 0x270   : > { %1768 = vmatpush3.bf16.msk.msra.mxu1 %vm1765_vm2, %v1941_v61 }
 0x342   : > { %v1722_v44 = vpop.f32.mrb[2].mxu1 }
 0x343   : > { %v1062_v45 = vadd.f32 %v1722_v44, %v1059_v43  ;;  %v1038_v46 = vpop.f32.mrb[3].mxu1 }
 0x344   : > { %v1061_v48 = vadd.f32 %v1054_v42, %v1038_v46 }
 0x345   : > { %v1064_v50 = vmax.f32 %v1062_v45, 0.0 }
 0x346   : > { %v1063_v51 = vmax.f32 %v1061_v48, 0.0 }
 0x347   : > { %v1071_v52 = vsel %vm2150_vm15, %v1064_v50, 0.0 }
 0x348   : > { %v1070_v53 = vsel %vm2150_vm15, %v1063_v51, 0.0  ;;  %v1755_v54 = vpack.c.bf16 %v1064_v50, %v1063_v51 }
 0x349   : > { %v1848_v55 = vpack.i.bf16 %v1071_v52, %v1070_v53 }
 0x34b   : > { %1849 = vrot.lane.b32.xlu0 %v1848_v55, %s1939_s21  ;;  %1844 = vrot.lane.b32.xlu1 %v1848_v55, %s1940_s26  ;;  %s1658_s21 = sshll.u32 %s1923_s16, 7  ;;  %s1472_s26 = sshll.u32 %s457_s22, 4  ;;  %s1473_s26 = int_to_ptr.vmem [resolvable:$true] %s1472_s26 }
 0x34c   : > { %s2203_s19 = scalar_lea.hbm %s2262_s10, %s1658_s21  ;;  %s1853_s24 = scalar_lea.vmem %s1473_s26, 128 }
 0x34d   : > { %p1854_p12 = scmp.ne.s32.totalorder %s1473_s26, %s1853_s24  ;;  %p1860_p1 = scmp.lt.s32.totalorder %s1473_s26, %s1858_s17 }
 0x34e   : > { %p1861_p2 = scmp.lt.s32.totalorder %s1859_s28, %s1853_s24 }
 0x34f   : > { %1358 = vperm.xlu0 %1842, %v1350_v56   ;;  %1353 = vperm.xlu1 %1841, %v1349_v57   ;;  %p1855_p13 = pnand %p1854_p12, %p2038_p4 }
 0x350   : > { %p1862_p3 = por %p1861_p2, %p1860_p1 }
 0x351   : > { %p1856_p0 = pneg %p1855_p13 }
 0x353   : > { %p1863_p5 = pnand %p1862_p3, %p1856_p0 }
 0x3bd   : > { %v1845_v62 = vpop.permute.xlu1 %1844  ;;  %v1850_v1 = vpop.permute.xlu0 %1849 }
 0x3be   : > { %v1847_v63 = vunpack.i.h.bf16 %v1845_v62  ;;  %v1846_v0 = vunpack.i.l.bf16 %v1845_v62  ;;  %v1852_v3 = vunpack.i.h.bf16 %v1850_v1  ;;  %v1851_v4 = vunpack.i.l.bf16 %v1850_v1 }
 0x3c0   : > { %v1751_v2 = vpack.c.bf16 %v1847_v63, %v1846_v0  ;;  %v1761_v7 = vpack.c.bf16 %v1852_v3, %v1851_v4 }
 0x3c2   : > { %1752 = vmatprep.subr.bf16.mxu0 %v1751_v2 }
 0x3c3   : > { %1754 = vmatpush3.bf16.msra.mxu0 %v1751_v2 }
 0x3c4   : > { %1757 = vmatprep.subr.msk.bf16.mxu0 %vm1756_vm3, %v1755_v54 }
 0x3c6   : > { %1728 = vmatmul.mubr.msk.f32.vlgmr.msra.gmra.mrb[4].mxu0 %vm790_vm12, %v1640_v5 }
 0x3c7   : > { %1760 = vmatpush3.bf16.msk.msra.mxu0 %vm1756_vm3, %v1755_v54  ;;  %1734 = vmatprep.mubr.msk.f32.mxu0 %vm790_vm12, %v1072_v6 }
 0x3c8   : > { %1762 = vmatprep.subr.bf16.mxu0 %v1761_v7 }
 0x3ce   : > { %1735 = vmatmul.mubr.msk.f32.vlgmr.msra.gmra.mrb[4].mxu0 %vm790_vm12, %v1073_v8 }
 0x3cf   : > { %1764 = vmatpush3.bf16.msra.mxu0 %v1761_v7  ;;  %1741 = vmatprep.mubr.msk.f32.mxu0 %vm790_vm12, %v1647_v9 }
 0x3d6   : > { %1742 = vmatmul.mubr.msk.f32.vlgmr.msra.gmra.mrb[4].mxu0 %vm790_vm12, %v1648_v10 }
 0x4a9   : > { %v1743_v11 = vpop.f32.mrb[4].mxu0 }
 0x4aa   : > { %v1328_v12 = vpop.f32.mrb[5].mxu0 }
 0x4ab   : > { %1748 = vmatprep.mubr.msk.f32.mxu1 %vm790_vm12, %v1328_v12 }
 0x4ac   : > { %1749 = vmatmul.mubr.msk.f32.vlgmr.msra.gmra.mrb[4].mxu1 %vm790_vm12, %v1743_v11 }
 0x4ad   : > { %1866 = shalt.err (!%p1863_p5)
}
 0x4ae   : > { %s1867_s16 = scalar_lea.hbm %s2203_s19, 128  ;;  %s1871_s22 = scalar_lea.hbm %s2262_s10, 256 }
 0x4af   : > { %p1868_p6 = scmp.ne.s32.totalorder %s2203_s19, %s1867_s16  ;;  %p1872_p10 = scmp.lt.u32.totalorder %s2203_s19, %s2262_s10 }
 0x4b0   : > { %p1873_p11 = scmp.lt.u32.totalorder %s1871_s22, %s1867_s16  ;;  %p1875_p13 = scmp.lt.u32.totalorder %s1867_s16, %s2203_s19 }
 0x4b1   : > { %p1869_p7 = pnand %p1868_p6, %p2038_p4 }
 0x4b2   : > { %p1874_p12 = por %p1873_p11, %p1872_p10 }
 0x4b3   : > { %p1870_p9 = pneg %p1869_p7 }
 0x4b4   : > { %p1876_p0 = por %p1875_p13, %p1874_p12 }
 0x4b6   : > { %p1877_p1 = pnand %p1876_p0, %p1870_p9 }
 0x4b8   : > { %1880 = shalt.err (!%p1877_p1)
}
 0x4b9   : > { %1777 = dma.vmem_to_hbm [thread:$0]  (%p2038_p4), %s1473_s26, 128, %s2203_s19, %s1455_s20   ;;  %v1359_v13 = vpop.permute.xlu0 %1358  ;;  %v1354_v15 = vpop.permute.xlu1 %1353 }
 0x4ba   : > { %s1661_s12 = sshll.u32 %s2055_s27, 4 }
 0x4bb   : > { %s498_s17 = scalar_lea.vmem %s2261_s9, %s1661_s12 }
 0x57f   : > { %v1750_v14 = vpop.f32.mrb[4].mxu1 }
 0x580   : > { %v1439_v16 = vadd.f32 %v1750_v14, %v1359_v13  ;;  %v1433_v17 = vpop.f32.mrb[5].mxu1 }
 0x581   : > { %v1434_v18 = vadd.f32 %v1433_v17, %v1354_v15 }
 0x582   : > { %v1443_v19 = vmax.f32 %v1439_v16, 0.0 }
 0x583   : > { %v1442_v20 = vmax.f32 %v1434_v18, 0.0 }
 0x584   : > { %1445 = vst.msk [vmem:[%s498_s17 + $0x8] sm:$0xff] %vm540_vm7, %v1443_v19 }
 0x585   : > { %1444 = vst.msk [vmem:[%s498_s17] sm:$0xff] %vm540_vm7, %v1442_v20 }
 0x586 PF: > { %p1783_p4 = scmp.ge.s32.totalorder %s1931_s18, 2  ;;  %s1495_s23 = sand.u32 1, %s1911_s13  }
 0x587   : > { %s1496_s27 = scalar_lea.sflag [#allocation3], %s1495_s23 }
 0x588   : > { %p1780_p2 = pnand %p1783_p4, %p2045_p8 }
 0x58a   : > { %1906 = dma.done.wait (!%p1780_p2), %s1496_s27, 128  }
 0x58b   : > { %1908 = vsyncadd (!%p1780_p2), %s1496_s27, 4294967168  ;;  %s24_s18 = sadd.s32 1, %s1931_s18   ;;  %s2276_s26 = sld [smem:[#allocation5_spill]] }
 0x58c   : > { %p21_p3 = scmp.ge.s32.totalorder %s24_s18, 4   ;;  %s2277_s15 = sld [smem:[#allocation8_spill]] }
 0x58d   : > { %s2278_s16 = sld [smem:[#allocation6_spill]]  ;;  %s2279_s17 = sld [smem:[#allocation7_spill]] }
 0x58e   : > { %s2280_s13 = smov %s1915_s14  ;;  %23 = sbr.rel (!%p21_p3) target bundleno = 4 (0x4), region = 115 }
 0x591   : > { %s2281_s14 = smov %s2276_s26 }
 0x595   :  { %1501 = vsyncpa [#allocation3], 1 }
 0x596   :  { %1503 = vsyncpa [#allocation3 + $0x1], 1 }

</bundles_post_ra>
